<compile_context>
chip_gen: v5e
topology: v5e:2x2
jax: 0.10.0
libtpu: 0.0.40
codegen_flags: <defaults>
</compile_context>

<pallas_src>
import math

import jax
import jax.numpy as jnp
from jax.experimental import pallas as pl
from jax.experimental.pallas import tpu as pltpu

# ---------------- configuration (module defaults, small batch) ----------------
FREQ_EMBED_SIZE = 256                  # frequency_embedding_size (module default)
HALF = FREQ_EMBED_SIZE // 2            # 128
HIDDEN_SIZE = 128                      # hidden_size
MAX_PERIOD = 10000.0
N_BATCH = 8                            # number of timesteps (batch)

# The PyTorch `if dim % 2` zero-pad branch is dead for even frequency_embedding_size;
# guard it instead of translating it.
assert FREQ_EMBED_SIZE % 2 == 0, "odd frequency_embedding_size not supported"
# misc packing (freqs | b1 | b2 as rows of one (3, 128) array) relies on HALF == H.
assert HALF == HIDDEN_SIZE, "misc-row packing assumes HALF == HIDDEN_SIZE"


# ---------------- Pallas kernel: whole forward, fused ----------------
def _timestep_embedder_kernel(t_ref, w1_ref, w2_ref, misc_ref, out_ref):
    # t_ref:    (N, 1)    f32   timesteps
    # w1_ref:   (256, H)  bf16  first Linear weight, rows 0:HALF = cos part, HALF: = sin part
    # w2_ref:   (H, H)    bf16  second Linear weight
    # misc_ref: (3, 128)  f32   row0 = freqs, row1 = b1, row2 = b2
    # out_ref:  (N, H)    f32
    t = t_ref[...]                                                   # (N, 1) f32
    misc = misc_ref[...]                                             # (3, 128) f32
    freqs = misc[0:1, :]                                             # (1, HALF)
    b1 = misc[1:2, :]                                                # (1, H)
    b2 = misc[2:3, :]                                                # (1, H)

    # sinusoidal embedding, f32 transcendentals on the EUP/VPU
    args = t * freqs                                                 # (N, HALF)
    emb = jnp.concatenate([jnp.cos(args), jnp.sin(args)], axis=-1)   # (N, 256), lane concat

    # Linear1: single K=256 bf16 MXU pass, f32 accumulation
    h = (jnp.dot(emb.astype(jnp.bfloat16), w1_ref[...],
                 preferred_element_type=jnp.float32)
         + b1)                                                       # (N, H) f32

    # SiLU: x * sigmoid(x); exp on EUP, approx reciprocal on EUP (idle slot)
    h = h * pl.reciprocal(1.0 + jnp.exp(-h), approx=True)

    # Linear2: bf16 MXU pass, f32 accumulation, full-lane unmasked store
    out_ref[...] = (jnp.dot(h.astype(jnp.bfloat16), w2_ref[...],
                            preferred_element_type=jnp.float32)
                    + b2)                                            # (N, H) f32


# ---------------- parameter packing (one-time, host side) ----------------
def pack_params(params):
    """f32 reference params -> kernel-ready bf16 weights + packed f32 misc rows."""
    freqs = jnp.exp(-math.log(MAX_PERIOD)
                    * jnp.arange(HALF, dtype=jnp.float32) / HALF)    # (HALF,)
    misc = jnp.stack([freqs,
                      params["b1"].reshape(HIDDEN_SIZE),
                      params["b2"].reshape(HIDDEN_SIZE)], axis=0)    # (3, 128) f32
    w1 = jnp.concatenate([params["w1_cos"], params["w1_sin"]], axis=0)  # (256, H)
    return {
        "w1": w1.astype(jnp.bfloat16),
        "w2": params["w2"].astype(jnp.bfloat16),
        "misc": misc.astype(jnp.float32),
    }


# ---------------- wrapper ----------------
def timestep_embedder_forward(t, packed):
    """t: (N,) float32 timesteps  ->  (N, HIDDEN_SIZE) f32 embeddings."""
    n = t.shape[0]
    t2 = t.astype(jnp.float32).reshape(n, 1)
    vmem = pl.BlockSpec(memory_space=pltpu.MemorySpace.VMEM)
    cost = pl.CostEstimate(
        flops=2 * n * (FREQ_EMBED_SIZE * HIDDEN_SIZE + HIDDEN_SIZE * HIDDEN_SIZE),
        transcendentals=2 * n * HALF + n * HIDDEN_SIZE,              # cos+sin, exp
        bytes_accessed=(FREQ_EMBED_SIZE * HIDDEN_SIZE * 2            # w1 bf16
                        + HIDDEN_SIZE * HIDDEN_SIZE * 2              # w2 bf16
                        + 3 * 128 * 4                                # misc f32
                        + n * 4                                      # t
                        + n * HIDDEN_SIZE * 4),                      # output
    )
    return pl.pallas_call(
        _timestep_embedder_kernel,
        out_shape=jax.ShapeDtypeStruct((n, HIDDEN_SIZE), jnp.float32),
        in_specs=[vmem] * 4,
        out_specs=vmem,
        cost_estimate=cost,
    )(t2, packed["w1"], packed["w2"], packed["misc"])


# ---------------- pure-JAX reference (mirrors the PyTorch module, full f32) ----------------
def timestep_embedder_reference(t, params):
    freqs = jnp.exp(-math.log(MAX_PERIOD)
                    * jnp.arange(HALF, dtype=jnp.float32) / HALF)
    args = t.astype(jnp.float32)[:, None] * freqs[None]
    emb = jnp.concatenate([jnp.cos(args), jnp.sin(args)], axis=-1)       # (N, 256)
    w1 = jnp.concatenate([params["w1_cos"], params["w1_sin"]], axis=0)   # (256, H)
    h = emb @ w1 + params["b1"]
    h = h * jax.nn.sigmoid(h)                                            # SiLU
    return h @ params["w2"] + params["b2"]


# ---------------- deterministic parameter init ----------------
def init_params(key):
    k1, k2, k3, k4, k5 = jax.random.split(key, 5)
    nrm = lambda k, shape, std: (std * jax.random.normal(k, shape)).astype(jnp.float32)
    return {
        # first Linear weight stored transposed (in, out) and split at row HALF
        "w1_cos": nrm(k1, (HALF, HIDDEN_SIZE), 0.02),
        "w1_sin": nrm(k2, (HALF, HIDDEN_SIZE), 0.02),
        "b1":     nrm(k3, (1, HIDDEN_SIZE), 0.02),
        "w2":     nrm(k4, (HIDDEN_SIZE, HIDDEN_SIZE), 0.02),
        "b2":     nrm(k5, (1, HIDDEN_SIZE), 0.02),
    }


if __name__ == "__main__":
    root = jax.random.PRNGKey(0)
    k_param, k_t = jax.random.split(root)
    params = init_params(k_param)
    packed = jax.tree_util.tree_map(jax.block_until_ready, pack_params(params))
    # fractional timesteps, as the PyTorch docstring allows
    t = jax.random.uniform(k_t, (N_BATCH,), jnp.float32, 0.0, 100.0)

    out = jax.block_until_ready(timestep_embedder_forward(t, packed))
    ref = jax.block_until_ready(timestep_embedder_reference(t, params))

    assert out.shape == (N_BATCH, HIDDEN_SIZE), out.shape
    assert bool(jnp.all(jnp.isfinite(out)))
    assert bool(jnp.allclose(out, ref, atol=1e-2, rtol=1e-2)), \
        float(jnp.max(jnp.abs(out - ref)))
    print("KERNEL_OK")
</pallas_src>

<mosaic_0001>
module attributes {stable_mosaic.version = 11 : i64} {
  func.func @_timestep_embedder_kernel(%arg0: memref<8x1xf32, #tpu.memory_space<vmem>>, %arg1: memref<256x128xbf16, #tpu.memory_space<vmem>>, %arg2: memref<128x128xbf16, #tpu.memory_space<vmem>>, %arg3: memref<3x128xf32, #tpu.memory_space<vmem>>, %arg4: memref<8x128xf32, #tpu.memory_space<vmem>>) attributes {dimension_semantics = [], scalar_prefetch = 0 : i64, scratch_operands = 0 : i64, tpu.core_type = #tpu.core_type<tc>} {
    %c0 = arith.constant 0 : index
    %c0_0 = arith.constant 0 : index
    %0 = vector.load %arg0[%c0, %c0_0] : memref<8x1xf32, #tpu.memory_space<vmem>>, vector<8x1xf32>
    %c0_1 = arith.constant 0 : index
    %c0_2 = arith.constant 0 : index
    %1 = vector.load %arg3[%c0_1, %c0_2] : memref<3x128xf32, #tpu.memory_space<vmem>>, vector<3x128xf32>
    %2 = vector.extract_strided_slice %1 {offsets = [0, 0], sizes = [1, 128], strides = [1, 1]} : vector<3x128xf32> to vector<1x128xf32>
    %3 = vector.extract_strided_slice %1 {offsets = [1, 0], sizes = [1, 128], strides = [1, 1]} : vector<3x128xf32> to vector<1x128xf32>
    %4 = vector.extract_strided_slice %1 {offsets = [2, 0], sizes = [1, 128], strides = [1, 1]} : vector<3x128xf32> to vector<1x128xf32>
    %5 = vector.broadcast %0 : vector<8x1xf32> to vector<8x128xf32>
    %6 = vector.broadcast %2 : vector<1x128xf32> to vector<8x128xf32>
    %7 = arith.mulf %5, %6 : vector<8x128xf32>
    %8 = math.cos %7 : vector<8x128xf32>
    %9 = math.sin %7 : vector<8x128xf32>
    %10 = tpu.concatenate %8, %9 in 1 : vector<8x128xf32>, vector<8x128xf32> -> vector<8x256xf32>
    %11 = arith.truncf %10 : vector<8x256xf32> to vector<8x256xbf16>
    %c0_3 = arith.constant 0 : index
    %c0_4 = arith.constant 0 : index
    %12 = vector.load %arg1[%c0_3, %c0_4] : memref<256x128xbf16, #tpu.memory_space<vmem>>, vector<256x128xbf16>
    %cst = arith.constant dense<0.000000e+00> : vector<8x128xf32>
    %13 = tpu.matmul %11, %12, %cst {dimension_numbers = #tpu.dot_dimension_numbers<[1], [0], [0], [1], [0, 0, 1, 1], [], []>} : vector<8x256xbf16>, vector<256x128xbf16>, vector<8x128xf32> -> vector<8x128xf32>
    %14 = vector.broadcast %3 : vector<1x128xf32> to vector<8x128xf32>
    %15 = arith.addf %13, %14 : vector<8x128xf32>
    %cst_5 = arith.constant 0.000000e+00 : f32
    %16 = vector.broadcast %cst_5 : f32 to vector<8x128xf32>
    %17 = arith.subf %16, %15 : vector<8x128xf32>
    %18 = math.exp %17 : vector<8x128xf32>
    %cst_6 = arith.constant 1.000000e+00 : f32
    %19 = vector.broadcast %cst_6 : f32 to vector<8x128xf32>
    %20 = arith.addf %19, %18 : vector<8x128xf32>
    %21 = tpu.reciprocal %20 {approx = true} : vector<8x128xf32> -> vector<8x128xf32>
    %22 = arith.mulf %15, %21 : vector<8x128xf32>
    %23 = arith.truncf %22 : vector<8x128xf32> to vector<8x128xbf16>
    %c0_7 = arith.constant 0 : index
    %c0_8 = arith.constant 0 : index
    %24 = vector.load %arg2[%c0_7, %c0_8] : memref<128x128xbf16, #tpu.memory_space<vmem>>, vector<128x128xbf16>
    %cst_9 = arith.constant dense<0.000000e+00> : vector<8x128xf32>
    %25 = tpu.matmul %23, %24, %cst_9 {dimension_numbers = #tpu.dot_dimension_numbers<[1], [0], [0], [1], [0, 0, 1, 1], [], []>} : vector<8x128xbf16>, vector<128x128xbf16>, vector<8x128xf32> -> vector<8x128xf32>
    %26 = vector.broadcast %4 : vector<1x128xf32> to vector<8x128xf32>
    %27 = arith.addf %25, %26 : vector<8x128xf32>
    %c0_10 = arith.constant 0 : index
    %c0_11 = arith.constant 0 : index
    %28 = vector.load %arg4[%c0_10, %c0_11] : memref<8x128xf32, #tpu.memory_space<vmem>>, vector<8x128xf32>
    tpu.vector_store %arg4[%c0_10, %c0_11], %27 {strides = array<i32>} : memref<8x128xf32, #tpu.memory_space<vmem>>, vector<8x128xf32>,
    return
  }
}

</mosaic_0001>

<bundles_post_ra>
// kernel: tpu_custom_call.1
= control target key start
LH: loop header
LB: loop body
LE: loop exit
PB: predicated region body
PF: predicated region fallthrough
CT: control target
= control target key end

     0   :  { %9 = vsyncpa [#allocation3], 0  ;;  %s968_s0 = inlined_call_operand.vmem [shape: f32[8,1], index: 0, kind: input, shape index: {}]   ;;  %s969_s1 = inlined_call_operand.hbm [shape: bf16[256,128], index: 1, kind: input, shape index: {}]   ;;  %s970_s2 = inlined_call_operand.hbm [shape: bf16[128,128], index: 2, kind: input, shape index: {}]   ;;  %s971_s3 = inlined_call_operand.vmem [shape: f32[3,128], index: 3, kind: input, shape index: {}]   ;;  %s972_s4 = inlined_call_operand.hbm [shape: f32[8,128], index: 4, kind: output, shape index: {}]  }
   0x1   :  { %10 = vsyncpa [#allocation6], 0 }
   0x2   :  { %11 = vsyncpa [#allocation4], 0  ;;  %s18_s17 = sshll.u32 %s969_s1, 4  ;;  %s850_s18 = smov [#allocation2]   ;;  %s19_s17 = int_to_ptr.hbm [resolvable:$true] %s18_s17 }
   0x3   :  { %s20_s19 = sshll.u32 %s850_s18, 4  ;;  %s31_s22 = sshll.u32 %s970_s2, 4  ;;  %s21_s19 = int_to_ptr.vmem [resolvable:$true] %s20_s19  ;;  %s32_s22 = int_to_ptr.hbm [resolvable:$true] %s31_s22 }
   0x4   :  { %s851_s23 = smov 64   ;;  %s852_s24 = smov 4  }
   0x5   :  { %26 = dma.hbm_to_vmem [thread:$0]  %s19_s17, 2048, %s21_s19, [#allocation3], %s851_s23, %s851_s23, %s852_s24  }
   0x6   :  { %s853_s25 = smov [#allocation5]  }
   0x7   :  { %s33_s26 = sshll.u32 %s853_s25, 4  ;;  %s34_s26 = int_to_ptr.vmem [resolvable:$true] %s33_s26 }
   0x8   :  { %39 = dma.hbm_to_vmem [thread:$0]  %s32_s22, 1024, %s34_s26, [#allocation6], %s851_s23, %s851_s23, %s852_s24  }
   0x9   :  { %844 = dma.done.wait [#allocation3], 2048  }
   0xa   :  { %845 = vsyncadd [#allocation3], 4294965248 }
   0xb   :  { %846 = dma.done.wait [#allocation6], 1024  }
   0xc   :  { %847 = vsyncadd [#allocation6], 4294966272  ;;  %v854_v0 = vmov 0   ;;  %v50_v1 = vld [vmem:[%s968_s0] sm:$0xff]  ;;  %v738_v2 = vld [vmem:[#allocation2 + $0x38] sm:$0xff]  ;;  %s861_s0 = smov [#allocation7]  }
   0xd   :  { %767 = vset.pattern.permute.xlu0 %v854_v0  ;;  %v746_v3 = vld [vmem:[#allocation2 + $0x78] sm:$0xff]  ;;  %499 = vmatpush.bf16.msra.mxu0 %v738_v2  ;;  %v737_v4 = vld [vmem:[#allocation2 + $0x30] sm:$0xff]  ;;  %v900_v6 = vld [vmem:[%s971_s3] sm:$0x7]  ;;  %v855_v31 = vmov 683565275  }
   0xe   :  { %54 = vperm.xlu0 %767, %v50_v1   ;;  %512 = vmatpush.bf16.msra.mxu1 %v746_v3  ;;  %v745_v5 = vld [vmem:[#allocation2 + $0x70] sm:$0xff]  ;;  %v57_v7 = vperm.slane %v900_v6, 0  ;;  %v736_v8 = vld [vmem:[#allocation2 + $0x28] sm:$0xff]  ;;  %v735_v12 = vld [vmem:[#allocation2 + $0x20] sm:$0xff]  ;;  %v856_v33 = vmov 2475754826  }
   0xf   :  { %v744_v9 = vld [vmem:[#allocation2 + $0x68] sm:$0xff]  ;;  %v743_v13 = vld [vmem:[#allocation2 + $0x60] sm:$0xff]  ;;  %v734_v16 = vld [vmem:[#allocation2 + $0x18] sm:$0xff]  ;;  %v857_v35 = vmov 2131351028   ;;  %s616_s3 = sshll.u32 %s861_s0, 4  ;;  %s617_s3 = int_to_ptr.vmem [resolvable:$true] %s616_s3 }
  0x10   :  { %v742_v17 = vld [vmem:[#allocation2 + $0x58] sm:$0xff]  ;;  %v733_v21 = vld [vmem:[#allocation2 + $0x10] sm:$0xff]  ;;  %v732_v26 = vld [vmem:[#allocation2 + $0x8] sm:$0xff]  ;;  %v858_v37 = vmov 2102212464   ;;  %s618_s5 = sshll.u32 %s972_s4, 4  ;;  %s619_s5 = int_to_ptr.hbm [resolvable:$true] %s618_s5 }
  0x11   :  { %500 = vmatpush.bf16.msra.mxu0 %v737_v4  ;;  %v741_v22 = vld [vmem:[#allocation2 + $0x50] sm:$0xff]  ;;  %v740_v28 = vld [vmem:[#allocation2 + $0x48] sm:$0xff]  ;;  %v859_v42 = vmov 920167782   ;;  %v731_v44 = vld [vmem:[#allocation2] sm:$0xff] }
  0x12   :  { %513 = vmatpush.bf16.msra.mxu1 %v745_v5  ;;  %v860_v46 = vmov 1326507024   ;;  %v739_v49 = vld [vmem:[#allocation2 + $0x40] sm:$0xff] }
  0x15   :  { %501 = vmatpush.bf16.msra.mxu0 %v736_v8 }
  0x16   :  { %514 = vmatpush.bf16.msra.mxu1 %v744_v9 }
  0x19   :  { %502 = vmatpush.bf16.msra.mxu0 %v735_v12 }
  0x1a   :  { %515 = vmatpush.bf16.msra.mxu1 %v743_v13 }
  0x1d   :  { %503 = vmatpush.bf16.msra.mxu0 %v734_v16 }
  0x1e   :  { %516 = vmatpush.bf16.msra.mxu1 %v742_v17 }
  0x21   :  { %504 = vmatpush.bf16.msra.mxu0 %v733_v21 }
  0x22   :  { %517 = vmatpush.bf16.msra.mxu1 %v741_v22 }
  0x25   :  { %505 = vmatpush.bf16.msra.mxu0 %v732_v26 }
  0x26   :  { %518 = vmatpush.bf16.msra.mxu1 %v740_v28 }
  0x29   :  { %506 = vmatpush.bf16.msra.mxu0 %v731_v44 }
  0x2a   :  { %519 = vmatpush.bf16.msra.mxu1 %v739_v49 }
  0x80   :  { %v55_v10 = vpop.permute.xlu0 %54 }
  0x81   :  { %v903_v11 = vmul.f32 %v57_v7, %v55_v10 }
  0x83   :  { %v62_v14 = vand.u32 2139095040, %v903_v11  ;;  %v59_v18 = vand.u32 2147483647, %v903_v11  ;;  %vm61_vm12 = vcmp.lt.s32.totalorder %v903_v11, 0 }
  0x85   :  { %v63_v15 = vshrl.u32 %v62_v14, 23  ;;  %v66_v23 = vand.u32 8388607, %v59_v18  ;;  %vm60_vm13 = vcmp.le.f32.partialorder %v59_v18, 0.7853982 }
  0x87   :  { %v629_v19 = vadd.s32 4294967169, %v63_v15  ;;  %v67_v27 = vor.u32 8388608, %v66_v23 }
  0x89   :  { %v69_v20 = vadd.s32 1, %v629_v19  ;;  %v919_v48 = vshll.u32 %v67_v27, 8 }
  0x8b   :  { %vm70_vm0 = vcmp.gt.s32.totalorder %v69_v20, 0  ;;  %v108_v61 = vand.u32 65535, %v919_v48  ;;  %v109_v63 = vshrl.u32 %v919_v48, 16 }
  0x8c   :  { %v71_v24 = vsel %vm70_vm0, %v69_v20, 0 }
  0x8d   :  { %v73_v25 = vand.u32 31, %v71_v24  ;;  %v909_v29 = vshrl.u32 %v71_v24, 5 }
  0x8f   :  { %v911_v30 = vsub.s32 32, %v73_v25  ;;  %v76_v32 = vshll.u32 %v855_v31, %v73_v25  ;;  %v79_v34 = vshll.u32 %v856_v33, %v73_v25  ;;  %v82_v36 = vshll.u32 %v857_v35, %v73_v25 }
  0x90   :  { %v85_v38 = vshll.u32 %v858_v37, %v73_v25  ;;  %v88_v45 = vshll.u32 %v859_v42, %v73_v25  ;;  %vm91_vm1 = vcmp.lt.s32.totalorder %v909_v29, 1  ;;  %vm94_vm2 = vcmp.lt.s32.totalorder %v909_v29, 4 }
  0x91   :  { %v77_v39 = vshrl.u32 %v856_v33, %v911_v30  ;;  %v80_v40 = vshrl.u32 %v857_v35, %v911_v30  ;;  %v83_v41 = vshrl.u32 %v858_v37, %v911_v30  ;;  %v86_v43 = vshrl.u32 %v859_v42, %v911_v30 }
  0x92   :  { %v89_v47 = vshrl.u32 %v860_v46, %v911_v30  ;;  %vm93_vm3 = vcmp.lt.s32.totalorder %v909_v29, 3  ;;  %vm92_vm4 = vcmp.lt.s32.totalorder %v909_v29, 2  ;;  %v75_v27 = vshrl.u32 %v855_v31, %v911_v30 }
  0x93   :  { %v78_v50 = vor.u32 %v77_v39, %v76_v32  ;;  %v81_v51 = vor.u32 %v80_v40, %v79_v34  ;;  %v84_v52 = vor.u32 %v83_v41, %v82_v36  ;;  %v87_v53 = vor.u32 %v86_v43, %v85_v38 }
  0x94   :  { %v90_v54 = vor.u32 %v89_v47, %v88_v45 }
  0x95   :  { %v99_v55 = vsel %vm91_vm1, %v78_v50, %v81_v51  ;;  %v100_v56 = vsel %vm94_vm2, %v87_v53, 920167782  ;;  %v103_v57 = vsel %vm91_vm1, %v81_v51, %v84_v52  ;;  %v96_v24 = vsel %vm94_vm2, %v84_v52, 2102212464 }
  0x96   :  { %v101_v58 = vsel %vm93_vm3, %v84_v52, %v100_v56  ;;  %v104_v59 = vsel %vm94_vm2, %v90_v54, 1326507024  ;;  %v95_v36 = vsel %vm91_vm1, %v75_v27, %v78_v50  ;;  %v97_v37 = vsel %vm93_vm3, %v81_v51, %v96_v24 }
  0x97   :  { %v105_v60 = vsel %vm93_vm3, %v87_v53, %v104_v59  ;;  %v102_v62 = vsel %vm92_vm4, %v99_v55, %v101_v58  ;;  %v98_v31 = vsel %vm92_vm4, %v95_v36, %v97_v37 }
  0x98   :  { %v106_v1 = vsel %vm92_vm4, %v103_v57, %v105_v60  ;;  %v132_v2 = vand.u32 65535, %v102_v62  ;;  %v133_v3 = vshrl.u32 %v102_v62, 16  ;;  %v152_v46 = vmul.u32 %v919_v48, %v98_v31 }
  0x99   :  { %v110_v4 = vand.u32 65535, %v106_v1  ;;  %v111_v5 = vshrl.u32 %v106_v1, 16  ;;  %vm202_vm4 = vweird.f32 %v903_v11 }
  0x9a   :  { %v135_v7 = vmul.u32 %v133_v3, %v108_v61  ;;  %v136_v8 = vmul.u32 %v132_v2, %v109_v63  ;;  %v134_v12 = vmul.u32 %v132_v2, %v108_v61  ;;  %v137_v16 = vmul.u32 %v133_v3, %v109_v63  ;;  %v754_v3 = vld [vmem:[#allocation5 + $0x38] sm:$0xff] }
  0x9b   :  { %v113_v9 = vmul.u32 %v111_v5, %v108_v61  ;;  %v114_v10 = vmul.u32 %v110_v4, %v109_v63  ;;  %v112_v14 = vmul.u32 %v110_v4, %v108_v61  ;;  %v115_v17 = vmul.u32 %v111_v5, %v109_v63  ;;  %597 = vmatpush.bf16.msra.mxu2 %v754_v3 }
  0x9c   :  { %v138_v13 = vshll.u32 %v135_v7, 16  ;;  %v140_v19 = vshll.u32 %v136_v8, 16  ;;  %v139_v34 = vshrl.u32 %v135_v7, 16  ;;  %v141_v40 = vshrl.u32 %v136_v8, 16 }
  0x9d   :  { %v116_v15 = vshll.u32 %v113_v9, 16  ;;  %v118_v21 = vshll.u32 %v114_v10, 16  ;;  %v117_v38 = vshrl.u32 %v113_v9, 16  ;;  %v119_v42 = vshrl.u32 %v114_v10, 16 }
  0x9e   :  { %vm142_vm5 = vc.u32 %v134_v12, %v138_v13  ;;  %v144_v20 = vadd.s32 %v138_v13, %v134_v12 }
  0x9f   :  { %vm120_vm6 = vc.u32 %v112_v14, %v116_v15  ;;  %v122_v22 = vadd.s32 %v116_v15, %v112_v14  ;;  %v143_v23 = vsel %vm142_vm5, 1, %v854_v0 }
  0xa0   :  { %v121_v25 = vsel %vm120_vm6, 1, %v854_v0  ;;  %v145_v26 = vadd.s32 %v143_v23, %v137_v16  ;;  %vm146_vm7 = vc.u32 %v144_v20, %v140_v19 }
  0xa1   :  { %v123_v28 = vadd.s32 %v121_v25, %v115_v17  ;;  %vm124_vm8 = vc.u32 %v122_v22, %v118_v21  ;;  %v147_v32 = vsel %vm146_vm7, 1, %v854_v0 }
  0xa2   :  { %v125_v33 = vsel %vm124_vm8, 1, %v854_v0  ;;  %v149_v35 = vadd.s32 %v147_v32, %v145_v26  ;;  %v148_v0 = vadd.s32 %v144_v20, %v140_v19 }
  0xa3   :  { %v127_v39 = vadd.s32 %v125_v33, %v123_v28 }
  0xa4   :  { %v150_v41 = vadd.s32 %v149_v35, %v139_v34 }
  0xa5   :  { %v128_v30 = vadd.s32 %v127_v39, %v117_v38 }
  0xa6   :  { %v151_v43 = vadd.s32 %v150_v41, %v141_v40 }
  0xa7   :  { %v129_v44 = vadd.s32 %v128_v30, %v119_v42 }
  0xa8   :  { %v155_v45 = vadd.s32 1, %v151_v43 }
  0xa9   :  { %vm154_vm9 = vc.u32 %v129_v44, %v148_v0  ;;  %v153_v58 = vadd.s32 %v148_v0, %v129_v44  ;;  %v753_v0 = vld [vmem:[#allocation5 + $0x30] sm:$0xff] }
  0xaa   :  { %v156_v47 = vsel %vm154_vm9, %v155_v45, %v151_v43  ;;  %598 = vmatpush.bf16.msra.mxu2 %v753_v0  ;;  %v752_v45 = vld [vmem:[#allocation5 + $0x28] sm:$0xff] }
  0xab   :  { %v157_v49 = vadd.s32 %v156_v47, %v152_v46  ;;  %v751_v46 = vld [vmem:[#allocation5 + $0x20] sm:$0xff]  ;;  %v750_v47 = vld [vmem:[#allocation5 + $0x18] sm:$0xff] }
  0xad   :  { %v158_v50 = vadd.s32 536870912, %v157_v49 }
  0xae   :  { %599 = vmatpush.bf16.msra.mxu2 %v752_v45 }
  0xaf   :  { %v159_v51 = vshrl.u32 %v158_v50, 30  ;;  %v748_v50 = vld [vmem:[#allocation5 + $0x8] sm:$0xff] }
  0xb1   :  { %v160_v52 = vshll.u32 %v159_v51, 30  ;;  %v183_v10 = vsub.s32 4, %v159_v51 }
  0xb2   :  { %600 = vmatpush.bf16.msra.mxu2 %v751_v46 }
  0xb3   :  { %v161_v53 = vsub.s32 %v157_v49, %v160_v52  ;;  %v184_v16 = vsel %vm61_vm12, %v183_v10, %v159_v51  ;;  %v749_v49 = vld [vmem:[#allocation5 + $0x10] sm:$0xff]  ;;  %v402_v51 = vperm.slane %v900_v6, 1 }
  0xb4   :  { %v186_v20 = vsel %vm60_vm13, 0, %v184_v16 }
  0xb5   :  { %vm162_vm10 = vcmp.lt.s32.totalorder %v161_v53, 0  ;;  %v163_v54 = vsub.s32 0, %v161_v53  ;;  %v357_v25 = vadd.s32 3, %v186_v20  ;;  %v203_v32 = vand.u32 3, %v186_v20 }
  0xb6   :  { %601 = vmatpush.bf16.msra.mxu2 %v750_v47 }
  0xb7   :  { %v164_v55 = vsel %vm162_vm10, %v163_v54, %v161_v53  ;;  %v358_v33 = vand.u32 3, %v357_v25  ;;  %vm204_vm14 = vcmp.lt.s32.totalorder %v203_v32, 2  ;;  %vm205_vm15 = vcmp.eq.s32.totalorder %v203_v32, 0 }
  0xb8   :  { %v165_v56 = vclz %v164_v55  ;;  %vm208_vm0 = vcmp.eq.s32.totalorder %v203_v32, 2 }
  0xb9   :  { %vm359_vm1 = vcmp.lt.s32.totalorder %v358_v33, 2  ;;  %vm360_vm2 = vcmp.eq.s32.totalorder %v358_v33, 0  ;;  %vm363_vm3 = vcmp.eq.s32.totalorder %v358_v33, 2 }
  0xba   :  { %v630_v57 = vadd.s32 4294967294, %v165_v56  ;;  %602 = vmatpush.bf16.msra.mxu2 %v749_v49 }
  0xbc   :  { %vm631_vm11 = vcmp.lt.s32.totalorder %v630_v57, 0 }
  0xbd   :  { %v168_v29 = vsel %vm631_vm11, 0, %v630_v57 }
  0xbe   :  { %v169_v59 = vsub.s32 32, %v168_v29  ;;  %v173_v60 = vsub.s32 4294967266, %v168_v29  ;;  %v170_v61 = vshll.u32 %v161_v53, %v168_v29  ;;  %603 = vmatpush.bf16.msra.mxu2 %v748_v50 }
  0xc0   :  { %v171_v62 = vshrl.u32 %v153_v58, %v169_v59  ;;  %v174_v48 = vadd.s32 127, %v173_v60 }
  0xc2   :  { %v172_v63 = vor.u32 %v171_v62, %v170_v61  ;;  %v175_v1 = vshll.u32 %v174_v48, 23 }
  0xc4   :  { %v176_v2 = vor.u32 4788187, %v175_v1  ;;  %v179_v5 = vcvt.s32.f32 %v172_v63  ;;  %v548_v63 = vperm.slane %v900_v6, 2 }
  0xc6   :  { %v177_v4 = vand.u32 2147483647, %v176_v2 }
  0xc8   :  { %v180_v7 = vmul.f32 %v179_v5, %v177_v4 }
  0xca   :  { %v181_v8 = vxor.u32 2147483648, %v180_v7 }
  0xcc   :  { %v182_v9 = vsel %vm61_vm12, %v181_v8, %v180_v7 }
  0xcd   :  { %v185_v12 = vsel %vm60_vm13, %v903_v11, %v182_v9  ;;  %v747_v11 = vld [vmem:[#allocation5] sm:$0xff] }
  0xce   :  { %v187_v13 = vmul.f32 %v185_v12, %v185_v12  ;;  %604 = vmatpush.bf16.msra.mxu2 %v747_v11 }
  0xd0   :  { %v188_v14 = vmul.f32 -0.001358992, %v187_v13  ;;  %v195_v15 = vmul.f32 -0.00019511016, %v187_v13 }
  0xd2   :  { %v189_v17 = vadd.f32 0.041655596, %v188_v14  ;;  %v196_v19 = vadd.f32 0.008332121, %v195_v15 }
  0xd4   :  { %v190_v21 = vmul.f32 %v189_v17, %v187_v13  ;;  %v197_v22 = vmul.f32 %v196_v19, %v187_v13 }
  0xd6   :  { %v191_v23 = vadd.f32 -0.4999988, %v190_v21  ;;  %v198_v24 = vadd.f32 -0.16666654, %v197_v22 }
  0xd8   :  { %v192_v26 = vmul.f32 %v191_v23, %v187_v13  ;;  %v199_v27 = vmul.f32 %v198_v24, %v187_v13 }
  0xda   :  { %v193_v28 = vadd.f32 1.0, %v192_v26  ;;  %v200_v18 = vadd.f32 1.0, %v199_v27 }
  0xdc   :  { %v201_v34 = vmul.f32 %v200_v18, %v185_v12  ;;  %v209_v35 = vxor.u32 2147483648, %v193_v28 }
  0xde   :  { %v206_v36 = vxor.u32 2147483648, %v201_v34  ;;  %v210_v38 = vsel %vm208_vm0, %v209_v35, %v201_v34  ;;  %v365_v40 = vsel %vm363_vm3, %v209_v35, %v201_v34 }
  0xe0   :  { %v207_v37 = vsel %vm205_vm15, %v193_v28, %v206_v36  ;;  %v362_v39 = vsel %vm360_vm2, %v193_v28, %v206_v36 }
  0xe1   :  { %v211_v41 = vsel %vm204_vm14, %v207_v37, %v210_v38  ;;  %v366_v42 = vsel %vm359_vm1, %v362_v39, %v365_v40 }
  0xe2   :  { %v212_v30 = vsel %vm202_vm4, nan, %v211_v41  ;;  %v367_v31 = vsel %vm202_vm4, nan, %v366_v42 }
  0xe3   :  { %v368_v43 = vpack.c.bf16 %v212_v30, %v212_v30  ;;  %v369_v44 = vpack.c.bf16 %v367_v31, %v367_v31 }
  0xe5   :  { %507 = vmatmul.bf16.vlgmr.msra.gmra.mxu0 %v368_v43  ;;  %520 = vmatmul.bf16.vlgmr.msra.gmra.mxu1 %v369_v44 }
 0x162   :  { %v508_v52 = vpop.f32.mrf.mxu0  ;;  %v521_v53 = vpop.f32.mrf.mxu1 }
 0x163   :  { %v509_v54 = vadd.f32 %v508_v52, %v402_v51 }
 0x165   :  { %v522_v55 = vadd.f32 %v521_v53, %v509_v54 }
 0x167   :  { %v525_v56 = vsub.f32 0.0, %v522_v55 }
 0x169   :  { %v526_v57 = vmul.f32 1.442695, %v525_v56 }
 0x16a   :  { %v510_v29 = vpop.f32.mrf.mxu0  ;;  %v523_v58 = vpop.f32.mrf.mxu1 }
 0x16b   :  { %768 = vpow2.f32 %v526_v57 }
 0x171   :  { %v769_v59 = vpop.eup %768 }
 0x172   :  { %v528_v60 = vadd.f32 1.0, %v769_v59 }
 0x174   :  { %770 = vrcp.f32 %v528_v60 }
 0x17a   :  { %v771_v61 = vpop.eup %770 }
 0x17b   :  { %v530_v62 = vmul.f32 %v771_v61, %v522_v55 }
 0x17d   :  { %v531_v48 = vpack.c.bf16 %v530_v62, %v530_v62 }
 0x17f   :  { %605 = vmatmul.bf16.vlgmr.msra.gmra.mxu2 %v531_v48 }
 0x202   :  { %v606_v1 = vpop.f32.mrf.mxu2 }
 0x203   :  { %v607_v2 = vadd.f32 %v606_v1, %v548_v63 }
 0x205   :  { %610 = vst [vmem:[#allocation7] sm:$0xff] %v607_v2 }
 0x206   :  { %621 = dma.vmem_to_hbm [thread:$0]  %s617_s3, 128, %s619_s5, [#allocation4]  }
 0x20a   :  { %v608_v3 = vpop.f32.mrf.mxu2 }
 0x20b   :  { %848 = dma.done.wait [#allocation4], 128  }
 0x20c   :  { %849 = vsyncadd [#allocation4], 4294967168 }
 0x20d   :  { %626 = vsyncpa [#allocation3], 1 }
 0x20e   :  { %627 = vsyncpa [#allocation6], 1 }
 0x20f   :  { %628 = vsyncpa [#allocation4], 1 }

</bundles_post_ra>
